<compile_context>
chip_gen: v5e
topology: v5e:2x2
jax: 0.10.0
libtpu: 0.0.40
codegen_flags: <defaults>
</compile_context>

<pallas_src>
import math
import numpy as np
import jax
import jax.numpy as jnp
from jax.experimental import pallas as pl
from jax.experimental.pallas import tpu as pltpu


def _round_up(x, m):
    return (x + m - 1) // m * m


def rnn_chunk_kernel(x_ref, w_ref, out_ref, h_ref):
    """One (batch_chunk, time_chunk) grid step of the tanh RNN.

    x_ref   : (TILE_B, TILE_T, I_PAD)  input chunk, constant-1 bias column folded in
    w_ref   : (I_PAD + H_PAD, H_PAD)   fused weight [Wx^T ; b ; Wh^T] (zero padded)
    out_ref : (TILE_B, TILE_T, H_PAD)  hidden state for every timestep of the chunk
    h_ref   : (TILE_B, H_PAD) f32      VMEM scratch carrying h across time chunks
    """
    t_chunk = pl.program_id(1)

    @pl.when(t_chunk == 0)
    def _():
        h_ref[...] = jnp.zeros_like(h_ref)

    w = w_ref[...]            # load the fused weight once per chunk
    h = h_ref[...]            # recurrent state stays in f32 vregs

    tile_t = x_ref.shape[1]
    # Recurrence over the time chunk. TILE_T is small & static, so a Python
    # loop is the fully-unrolled fori_loop and keeps every slice index static.
    for tt in range(tile_t):
        xh = jnp.concatenate([x_ref[:, tt, :], h], axis=1)          # (TILE_B, K)
        h = jnp.tanh(jnp.dot(xh, w, preferred_element_type=jnp.float32))
        out_ref[:, tt, :] = h.astype(out_ref.dtype)

    h_ref[...] = h


def rnn_forward_padded(x_btd, w_x, w_h, b, *, tile_t=8):
    """x_btd: (B, T, I) padded batch-first input. Returns (B, T, H) hidden states.

    Matches the PyTorch module: h_t = tanh(x_t @ W_x^T + h_{t-1} @ W_h^T + b),
    h_0 = 0, computed for every (padded) timestep.
    """
    B, T, I = x_btd.shape
    H = w_h.shape[0]

    B_PAD = _round_up(B, 8)            # sublane multiple
    H_PAD = _round_up(H, 128)          # lane-dense output (unmasked full-lane stores)
    I_PAD = _round_up(I + 1, 128)      # +1 = constant "bias" feature
    T_PAD = _round_up(T, tile_t)       # tile_t must be a multiple of 8 (sublane dim)
    K = I_PAD + H_PAD                  # fused contraction dim (one MXU pass on v6e/v7x)
    TILE_B = min(B_PAD, 128)

    f32 = jnp.float32
    # Fold the bias into the input matmul: append a constant-1 feature to x.
    x_aug = jnp.concatenate(
        [x_btd.astype(f32), jnp.ones((B, T, 1), f32)], axis=-1)            # (B, T, I+1)
    x_pad = jnp.pad(
        x_aug, ((0, B_PAD - B), (0, T_PAD - T), (0, I_PAD - (I + 1))))     # (B_PAD, T_PAD, I_PAD)

    # Fused weight so that [x_t | 1 | h] @ W_cat == x_t @ Wx^T + b + h @ Wh^T.
    # Padded rows/cols are zero, so padded lanes of h stay exactly 0.
    w_cat = jnp.zeros((K, H_PAD), f32)
    w_cat = w_cat.at[:I, :H].set(jnp.transpose(w_x).astype(f32))
    w_cat = w_cat.at[I, :H].set(b.astype(f32))
    w_cat = w_cat.at[I_PAD:I_PAD + H, :H].set(jnp.transpose(w_h).astype(f32))

    grid = (B_PAD // TILE_B, T_PAD // tile_t)

    out = pl.pallas_call(
        rnn_chunk_kernel,
        out_shape=jax.ShapeDtypeStruct((B_PAD, T_PAD, H_PAD), f32),
        grid_spec=pltpu.PrefetchScalarGridSpec(
            num_scalar_prefetch=0,
            grid=grid,
            in_specs=[
                pl.BlockSpec((TILE_B, tile_t, I_PAD), lambda bb, tt: (bb, tt, 0)),
                # NOTE: at realistic H, add pipeline_mode=pl.Buffered(1) here (the
                # weight block never changes) and raise vmem_limit_bytes for v7x's
                # 64 MiB VMEM; at this size the default budget is ample.
                pl.BlockSpec((K, H_PAD), lambda bb, tt: (0, 0)),
            ],
            out_specs=pl.BlockSpec((TILE_B, tile_t, H_PAD), lambda bb, tt: (bb, tt, 0)),
            scratch_shapes=[pltpu.VMEM((TILE_B, H_PAD), f32)],
        ),
        compiler_params=pltpu.CompilerParams(
            # batch chunks are independent (v7x megacore); time is a recurrence.
            dimension_semantics=("parallel", "arbitrary")),
    )(x_pad, w_cat)

    return out[:B, :T, :H]


def pack_padded(padded_bth, lengths):
    """Emulate torch pack_padded_sequence(batch_first=True) on the output (glue)."""
    B, T, _ = padded_bth.shape
    rows = []
    batch_sizes = []
    for t in range(T):
        idx = [bb for bb in range(B) if lengths[bb] > t]
        if not idx:
            break
        batch_sizes.append(len(idx))
        rows.append(padded_bth[np.array(idx), t])
    data = jnp.concatenate(rows, axis=0)
    return data, np.array(batch_sizes, dtype=np.int64)


def reference_forward_padded(x_btd, w_x, w_h, b):
    B, T, _ = x_btd.shape
    H = w_h.shape[0]
    h = jnp.zeros((B, H), jnp.float32)
    outs = []
    for t in range(T):
        h = jnp.tanh(x_btd[:, t] @ w_x.T + h @ w_h.T + b)
        outs.append(h)
    return jnp.stack(outs, axis=1)


if __name__ == "__main__":
    # Module config (input_size must equal hidden_size for the PyTorch code path)
    input_size = 32
    hidden_size = 32
    B, T = 2, 16
    lengths = [16, 11]  # sorted decreasing, as pack_padded_sequence(enforce_sorted=True) requires

    key = jax.random.PRNGKey(0)
    k_wx, k_wh, k_x = jax.random.split(key, 3)
    stdv = 1.0 / math.sqrt(hidden_size)
    W_x = jax.random.uniform(k_wx, (input_size, hidden_size), jnp.float32, -stdv, stdv)
    W_h = jax.random.uniform(k_wh, (hidden_size, hidden_size), jnp.float32, -stdv, stdv)
    b = jnp.zeros((hidden_size,), jnp.float32)

    # Padded input (zeros past each sequence length, like pad_packed_sequence output)
    x = jax.random.normal(k_x, (B, T, input_size), jnp.float32)
    mask = (jnp.arange(T)[None, :] < jnp.array(lengths)[:, None]).astype(jnp.float32)
    x = x * mask[:, :, None]

    rnn_forward = jax.jit(rnn_forward_padded, static_argnames=("tile_t",))
    out_padded = rnn_forward(x, W_x, W_h, b, tile_t=8)
    out_padded = jax.block_until_ready(out_padded)

    ref_padded = reference_forward_padded(x, W_x, W_h, b)
    np.testing.assert_allclose(np.asarray(out_padded), np.asarray(ref_padded),
                               rtol=2e-5, atol=2e-5)

    # TODO(synk): PackedSequence is a host-side data-layout container; emulated in plain JAX/numpy glue.
    packed_data, batch_sizes = pack_padded(out_padded, lengths)
    jax.block_until_ready(packed_data)

    print("KERNEL_OK")
</pallas_src>

<mosaic_0001>
module attributes {stable_mosaic.version = 11 : i64} {
  func.func @rnn_chunk_kernel(%arg0: i32, %arg1: i32, %arg2: memref<8x8x128xf32, #tpu.memory_space<vmem>>, %arg3: memref<256x128xf32, #tpu.memory_space<vmem>>, %arg4: memref<8x8x128xf32, #tpu.memory_space<vmem>>, %arg5: memref<8x128xf32, #tpu.memory_space<vmem>>) attributes {dimension_semantics = [#tpu.dimension_semantics<parallel>, #tpu.dimension_semantics<arbitrary>], iteration_bounds = array<i64: 1, 2>, scalar_prefetch = 0 : i64, scratch_operands = 1 : i64, tpu.core_type = #tpu.core_type<tc>, window_params = [{transform_indices = @transform_0, window_bounds = array<i64: 8, 8, 128>}, {pipeline_mode = #tpu.pipeline_mode<synchronous>, transform_indices = @transform_1, window_bounds = array<i64: 256, 128>}, {transform_indices = @transform_2, window_bounds = array<i64: 8, 8, 128>}]} {
    %c0_i32 = arith.constant 0 : i32
    %0 = arith.cmpi eq, %arg1, %c0_i32 : i32
    %1 = arith.extui %0 : i1 to i32
    %c0_i32_0 = arith.constant 0 : i32
    %2 = arith.cmpi ne, %1, %c0_i32_0 : i32
    scf.if %2 {
      %cst_54 = arith.constant 0.000000e+00 : f32
      %70 = vector.broadcast %cst_54 : f32 to vector<8x128xf32>
      %c0_55 = arith.constant 0 : index
      %c0_56 = arith.constant 0 : index
      %71 = vector.load %arg5[%c0_55, %c0_56] : memref<8x128xf32, #tpu.memory_space<vmem>>, vector<8x128xf32>
      tpu.vector_store %arg5[%c0_55, %c0_56], %70 {strides = array<i32>} : memref<8x128xf32, #tpu.memory_space<vmem>>, vector<8x128xf32>,
    } else {
    }
    %c0 = arith.constant 0 : index
    %c0_1 = arith.constant 0 : index
    %3 = vector.load %arg3[%c0, %c0_1] : memref<256x128xf32, #tpu.memory_space<vmem>>, vector<256x128xf32>
    %c0_2 = arith.constant 0 : index
    %c0_3 = arith.constant 0 : index
    %4 = vector.load %arg5[%c0_2, %c0_3] : memref<8x128xf32, #tpu.memory_space<vmem>>, vector<8x128xf32>
    %c0_4 = arith.constant 0 : index
    %c0_5 = arith.constant 0 : index
    %c0_6 = arith.constant 0 : index
    %5 = vector.load %arg2[%c0_4, %c0_5, %c0_6] : memref<8x8x128xf32, #tpu.memory_space<vmem>>, vector<8x1x128xf32>
    %6 = vector.shape_cast %5 : vector<8x1x128xf32> to vector<8x128xf32>
    %7 = tpu.concatenate %6, %4 in 1 : vector<8x128xf32>, vector<8x128xf32> -> vector<8x256xf32>
    %cst = arith.constant dense<0.000000e+00> : vector<8x128xf32>
    %8 = tpu.matmul %7, %3, %cst {dimension_numbers = #tpu.dot_dimension_numbers<[1], [0], [0], [1], [0, 0, 1, 1], [], []>} : vector<8x256xf32>, vector<256x128xf32>, vector<8x128xf32> -> vector<8x128xf32>
    %9 = math.tanh %8 : vector<8x128xf32>
    %c0_7 = arith.constant 0 : index
    %c0_8 = arith.constant 0 : index
    %c0_9 = arith.constant 0 : index
    %10 = vector.load %arg4[%c0_7, %c0_8, %c0_9] : memref<8x8x128xf32, #tpu.memory_space<vmem>>, vector<8x1x128xf32>
    %11 = vector.shape_cast %10 : vector<8x1x128xf32> to vector<8x128xf32>
    %12 = vector.shape_cast %9 : vector<8x128xf32> to vector<8x1x128xf32>
    tpu.vector_store %arg4[%c0_7, %c0_8, %c0_9], %12 {strides = array<i32>} : memref<8x8x128xf32, #tpu.memory_space<vmem>>, vector<8x1x128xf32>,
    %c0_10 = arith.constant 0 : index
    %c1 = arith.constant 1 : index
    %c0_11 = arith.constant 0 : index
    %13 = vector.load %arg2[%c0_10, %c1, %c0_11] : memref<8x8x128xf32, #tpu.memory_space<vmem>>, vector<8x1x128xf32>
    %14 = vector.shape_cast %13 : vector<8x1x128xf32> to vector<8x128xf32>
    %15 = tpu.concatenate %14, %9 in 1 : vector<8x128xf32>, vector<8x128xf32> -> vector<8x256xf32>
    %cst_12 = arith.constant dense<0.000000e+00> : vector<8x128xf32>
    %16 = tpu.matmul %15, %3, %cst_12 {dimension_numbers = #tpu.dot_dimension_numbers<[1], [0], [0], [1], [0, 0, 1, 1], [], []>} : vector<8x256xf32>, vector<256x128xf32>, vector<8x128xf32> -> vector<8x128xf32>
    %17 = math.tanh %16 : vector<8x128xf32>
    %c0_13 = arith.constant 0 : index
    %c1_14 = arith.constant 1 : index
    %c0_15 = arith.constant 0 : index
    %18 = vector.load %arg4[%c0_13, %c1_14, %c0_15] : memref<8x8x128xf32, #tpu.memory_space<vmem>>, vector<8x1x128xf32>
    %19 = vector.shape_cast %18 : vector<8x1x128xf32> to vector<8x128xf32>
    %20 = vector.shape_cast %17 : vector<8x128xf32> to vector<8x1x128xf32>
    tpu.vector_store %arg4[%c0_13, %c1_14, %c0_15], %20 {strides = array<i32>} : memref<8x8x128xf32, #tpu.memory_space<vmem>>, vector<8x1x128xf32>,
    %c0_16 = arith.constant 0 : index
    %c2 = arith.constant 2 : index
    %c0_17 = arith.constant 0 : index
    %21 = vector.load %arg2[%c0_16, %c2, %c0_17] : memref<8x8x128xf32, #tpu.memory_space<vmem>>, vector<8x1x128xf32>
    %22 = vector.shape_cast %21 : vector<8x1x128xf32> to vector<8x128xf32>
    %23 = tpu.concatenate %22, %17 in 1 : vector<8x128xf32>, vector<8x128xf32> -> vector<8x256xf32>
    %cst_18 = arith.constant dense<0.000000e+00> : vector<8x128xf32>
    %24 = tpu.matmul %23, %3, %cst_18 {dimension_numbers = #tpu.dot_dimension_numbers<[1], [0], [0], [1], [0, 0, 1, 1], [], []>} : vector<8x256xf32>, vector<256x128xf32>, vector<8x128xf32> -> vector<8x128xf32>
    %25 = math.tanh %24 : vector<8x128xf32>
    %c0_19 = arith.constant 0 : index
    %c2_20 = arith.constant 2 : index
    %c0_21 = arith.constant 0 : index
    %26 = vector.load %arg4[%c0_19, %c2_20, %c0_21] : memref<8x8x128xf32, #tpu.memory_space<vmem>>, vector<8x1x128xf32>
    %27 = vector.shape_cast %26 : vector<8x1x128xf32> to vector<8x128xf32>
    %28 = vector.shape_cast %25 : vector<8x128xf32> to vector<8x1x128xf32>
    tpu.vector_store %arg4[%c0_19, %c2_20, %c0_21], %28 {strides = array<i32>} : memref<8x8x128xf32, #tpu.memory_space<vmem>>, vector<8x1x128xf32>,
    %c0_22 = arith.constant 0 : index
    %c3 = arith.constant 3 : index
    %c0_23 = arith.constant 0 : index
    %29 = vector.load %arg2[%c0_22, %c3, %c0_23] : memref<8x8x128xf32, #tpu.memory_space<vmem>>, vector<8x1x128xf32>
    %30 = vector.shape_cast %29 : vector<8x1x128xf32> to vector<8x128xf32>
    %31 = tpu.concatenate %30, %25 in 1 : vector<8x128xf32>, vector<8x128xf32> -> vector<8x256xf32>
    %cst_24 = arith.constant dense<0.000000e+00> : vector<8x128xf32>
    %32 = tpu.matmul %31, %3, %cst_24 {dimension_numbers = #tpu.dot_dimension_numbers<[1], [0], [0], [1], [0, 0, 1, 1], [], []>} : vector<8x256xf32>, vector<256x128xf32>, vector<8x128xf32> -> vector<8x128xf32>
    %33 = math.tanh %32 : vector<8x128xf32>
    %c0_25 = arith.constant 0 : index
    %c3_26 = arith.constant 3 : index
    %c0_27 = arith.constant 0 : index
    %34 = vector.load %arg4[%c0_25, %c3_26, %c0_27] : memref<8x8x128xf32, #tpu.memory_space<vmem>>, vector<8x1x128xf32>
    %35 = vector.shape_cast %34 : vector<8x1x128xf32> to vector<8x128xf32>
    %36 = vector.shape_cast %33 : vector<8x128xf32> to vector<8x1x128xf32>
    tpu.vector_store %arg4[%c0_25, %c3_26, %c0_27], %36 {strides = array<i32>} : memref<8x8x128xf32, #tpu.memory_space<vmem>>, vector<8x1x128xf32>,
    %c0_28 = arith.constant 0 : index
    %c4 = arith.constant 4 : index
    %c0_29 = arith.constant 0 : index
    %37 = vector.load %arg2[%c0_28, %c4, %c0_29] : memref<8x8x128xf32, #tpu.memory_space<vmem>>, vector<8x1x128xf32>
    %38 = vector.shape_cast %37 : vector<8x1x128xf32> to vector<8x128xf32>
    %39 = tpu.concatenate %38, %33 in 1 : vector<8x128xf32>, vector<8x128xf32> -> vector<8x256xf32>
    %cst_30 = arith.constant dense<0.000000e+00> : vector<8x128xf32>
    %40 = tpu.matmul %39, %3, %cst_30 {dimension_numbers = #tpu.dot_dimension_numbers<[1], [0], [0], [1], [0, 0, 1, 1], [], []>} : vector<8x256xf32>, vector<256x128xf32>, vector<8x128xf32> -> vector<8x128xf32>
    %41 = math.tanh %40 : vector<8x128xf32>
    %c0_31 = arith.constant 0 : index
    %c4_32 = arith.constant 4 : index
    %c0_33 = arith.constant 0 : index
    %42 = vector.load %arg4[%c0_31, %c4_32, %c0_33] : memref<8x8x128xf32, #tpu.memory_space<vmem>>, vector<8x1x128xf32>
    %43 = vector.shape_cast %42 : vector<8x1x128xf32> to vector<8x128xf32>
    %44 = vector.shape_cast %41 : vector<8x128xf32> to vector<8x1x128xf32>
    tpu.vector_store %arg4[%c0_31, %c4_32, %c0_33], %44 {strides = array<i32>} : memref<8x8x128xf32, #tpu.memory_space<vmem>>, vector<8x1x128xf32>,
    %c0_34 = arith.constant 0 : index
    %c5 = arith.constant 5 : index
    %c0_35 = arith.constant 0 : index
    %45 = vector.load %arg2[%c0_34, %c5, %c0_35] : memref<8x8x128xf32, #tpu.memory_space<vmem>>, vector<8x1x128xf32>
    %46 = vector.shape_cast %45 : vector<8x1x128xf32> to vector<8x128xf32>
    %47 = tpu.concatenate %46, %41 in 1 : vector<8x128xf32>, vector<8x128xf32> -> vector<8x256xf32>
    %cst_36 = arith.constant dense<0.000000e+00> : vector<8x128xf32>
    %48 = tpu.matmul %47, %3, %cst_36 {dimension_numbers = #tpu.dot_dimension_numbers<[1], [0], [0], [1], [0, 0, 1, 1], [], []>} : vector<8x256xf32>, vector<256x128xf32>, vector<8x128xf32> -> vector<8x128xf32>
    %49 = math.tanh %48 : vector<8x128xf32>
    %c0_37 = arith.constant 0 : index
    %c5_38 = arith.constant 5 : index
    %c0_39 = arith.constant 0 : index
    %50 = vector.load %arg4[%c0_37, %c5_38, %c0_39] : memref<8x8x128xf32, #tpu.memory_space<vmem>>, vector<8x1x128xf32>
    %51 = vector.shape_cast %50 : vector<8x1x128xf32> to vector<8x128xf32>
    %52 = vector.shape_cast %49 : vector<8x128xf32> to vector<8x1x128xf32>
    tpu.vector_store %arg4[%c0_37, %c5_38, %c0_39], %52 {strides = array<i32>} : memref<8x8x128xf32, #tpu.memory_space<vmem>>, vector<8x1x128xf32>,
    %c0_40 = arith.constant 0 : index
    %c6 = arith.constant 6 : index
    %c0_41 = arith.constant 0 : index
    %53 = vector.load %arg2[%c0_40, %c6, %c0_41] : memref<8x8x128xf32, #tpu.memory_space<vmem>>, vector<8x1x128xf32>
    %54 = vector.shape_cast %53 : vector<8x1x128xf32> to vector<8x128xf32>
    %55 = tpu.concatenate %54, %49 in 1 : vector<8x128xf32>, vector<8x128xf32> -> vector<8x256xf32>
    %cst_42 = arith.constant dense<0.000000e+00> : vector<8x128xf32>
    %56 = tpu.matmul %55, %3, %cst_42 {dimension_numbers = #tpu.dot_dimension_numbers<[1], [0], [0], [1], [0, 0, 1, 1], [], []>} : vector<8x256xf32>, vector<256x128xf32>, vector<8x128xf32> -> vector<8x128xf32>
    %57 = math.tanh %56 : vector<8x128xf32>
    %c0_43 = arith.constant 0 : index
    %c6_44 = arith.constant 6 : index
    %c0_45 = arith.constant 0 : index
    %58 = vector.load %arg4[%c0_43, %c6_44, %c0_45] : memref<8x8x128xf32, #tpu.memory_space<vmem>>, vector<8x1x128xf32>
    %59 = vector.shape_cast %58 : vector<8x1x128xf32> to vector<8x128xf32>
    %60 = vector.shape_cast %57 : vector<8x128xf32> to vector<8x1x128xf32>
    tpu.vector_store %arg4[%c0_43, %c6_44, %c0_45], %60 {strides = array<i32>} : memref<8x8x128xf32, #tpu.memory_space<vmem>>, vector<8x1x128xf32>,
    %c0_46 = arith.constant 0 : index
    %c7 = arith.constant 7 : index
    %c0_47 = arith.constant 0 : index
    %61 = vector.load %arg2[%c0_46, %c7, %c0_47] : memref<8x8x128xf32, #tpu.memory_space<vmem>>, vector<8x1x128xf32>
    %62 = vector.shape_cast %61 : vector<8x1x128xf32> to vector<8x128xf32>
    %63 = tpu.concatenate %62, %57 in 1 : vector<8x128xf32>, vector<8x128xf32> -> vector<8x256xf32>
    %cst_48 = arith.constant dense<0.000000e+00> : vector<8x128xf32>
    %64 = tpu.matmul %63, %3, %cst_48 {dimension_numbers = #tpu.dot_dimension_numbers<[1], [0], [0], [1], [0, 0, 1, 1], [], []>} : vector<8x256xf32>, vector<256x128xf32>, vector<8x128xf32> -> vector<8x128xf32>
    %65 = math.tanh %64 : vector<8x128xf32>
    %c0_49 = arith.constant 0 : index
    %c7_50 = arith.constant 7 : index
    %c0_51 = arith.constant 0 : index
    %66 = vector.load %arg4[%c0_49, %c7_50, %c0_51] : memref<8x8x128xf32, #tpu.memory_space<vmem>>, vector<8x1x128xf32>
    %67 = vector.shape_cast %66 : vector<8x1x128xf32> to vector<8x128xf32>
    %68 = vector.shape_cast %65 : vector<8x128xf32> to vector<8x1x128xf32>
    tpu.vector_store %arg4[%c0_49, %c7_50, %c0_51], %68 {strides = array<i32>} : memref<8x8x128xf32, #tpu.memory_space<vmem>>, vector<8x1x128xf32>,
    %c0_52 = arith.constant 0 : index
    %c0_53 = arith.constant 0 : index
    %69 = vector.load %arg5[%c0_52, %c0_53] : memref<8x128xf32, #tpu.memory_space<vmem>>, vector<8x128xf32>
    tpu.vector_store %arg5[%c0_52, %c0_53], %65 {strides = array<i32>} : memref<8x128xf32, #tpu.memory_space<vmem>>, vector<8x128xf32>,
    return
  }
  func.func @transform_0(%arg0: i32, %arg1: i32) -> (i32, i32, i32) {
    %c0_i32 = arith.constant 0 : i32
    %c0_i32_0 = arith.constant 0 : i32
    return %arg0, %arg1, %c0_i32 : i32, i32, i32
  }
  func.func @transform_1(%arg0: i32, %arg1: i32) -> (i32, i32) {
    %c0_i32 = arith.constant 0 : i32
    %c0_i32_0 = arith.constant 0 : i32
    %c0_i32_1 = arith.constant 0 : i32
    return %c0_i32, %c0_i32_0 : i32, i32
  }
  func.func @transform_2(%arg0: i32, %arg1: i32) -> (i32, i32, i32) {
    %c0_i32 = arith.constant 0 : i32
    %c0_i32_0 = arith.constant 0 : i32
    return %arg0, %arg1, %c0_i32 : i32, i32, i32
  }
}

</mosaic_0001>

<bundles_post_ra>
// kernel: rnn_forward_padded.1
= control target key start
LH: loop header
LB: loop body
LE: loop exit
PB: predicated region body
PF: predicated region fallthrough
CT: control target
= control target key end

     0   :  { %s1297_s9 = smov 0   ;;  %s1299_s10 = smov 0   ;;  %s1982_s0 = inlined_call_operand.vmem [shape: f32[8,16,128], index: 0, kind: input, shape index: {}]   ;;  %s1983_s1 = inlined_call_operand.vmem [shape: f32[256,128], index: 1, kind: input, shape index: {}]   ;;  %s1984_s2 = inlined_call_operand.vmem [shape: f32[8,16,128], index: 2, kind: output, shape index: {}]  }
   0x1   :  { %s1301_s11 = smov 0   ;;  %s1303_s12 = smov 0  }
   0x2   :  { %s1305_s13 = smov 0  }
   0x3 LB: > { %s21_s14 = sadd.s32 1, %s1275_s12  ;;  %s1170_s15 = sadd.s32 4294967295, %s1279_s13   ;;  %s1279_s13 = sphi %s1305_s13, %s12_s13   ;;  %s1275_s12 = sphi %s1303_s12, %s1989_s12   ;;  %s1271_s11 = sphi %s1301_s11, %s1988_s11   ;;  %s1267_s10 = sphi %s1299_s10, %s1987_s10   ;;  %s1263_s9 = sphi %s1297_s9, %s1986_s9  }
   0x4   : > { %p22_p0 = scmp.ge.s32.totalorder %s21_s14, 2  ;;  %p40_p1 = scmp.ne.s32.totalorder %s1267_s10, %s1263_s9 }
   0x5   : > { %p41_p2 = scmp.eq.s32.totalorder %s1279_s13, 0  ;;  %p93_p4 = scmp.eq.s32.totalorder %s1170_s15, 1 }
   0x6   : > { %s1991_s14 = smov (%p22_p0, %s21_s14), 0  ;;  %s33_s17 = sadd.s32 1, %s1267_s10 }
   0x7   : > { %p42_p3 = por %p41_p2, %p40_p1  ;;  %s29_s16 = ssub.s32 %s1275_s12, %s1991_s14 }
   0x8   : > { %p31_p5 = scmp.eq.s32.totalorder %s29_s16, 0  ;;  %p1332_p6 = por %p93_p4, %p40_p1 }
   0x9   : > { %p1173_p7 = scmp.ge.s32.totalorder %s1279_s13, 2 }
   0xa   : > { %s1337_s19 = scalar_select %p31_p5, %s1267_s10, %s33_s17  }
   0xb   : > { %118 = sbr.rel (%p1173_p7) target bundleno = 28 (0x1c), region = 20 }
  0x10   : > { %121 = sbr.rel (!%p42_p3) target bundleno = 28 (0x1c), region = 24  ;;  %s123_s20 = sand.u32 (%p42_p3), 1, %s1267_s10  }
  0x11   : > { %s1175_s21 = sshll.u32 (%p42_p3), %s1275_s12, 3  ;;  %s1174_s22 = sshll.u32 (%p42_p3), %s123_s20, 6 }
  0x12   : > { %s130_s25 = scalar_lea.vmem (%p42_p3), %s1982_s0, %s1175_s21  ;;  %s125_s26 = scalar_lea.vmem (%p42_p3), [#allocation3], %s1174_s22 }
  0x13   : > { %v173_v0 = vld [vmem:[%s130_s25] sm:$0xff] (%p42_p3)  ;;  %v175_v1 = vld [vmem:[%s130_s25 + $0x10] sm:$0xff] (%p42_p3) }
  0x14   : > { %v177_v2 = vld [vmem:[%s130_s25 + $0x20] sm:$0xff] (%p42_p3)  ;;  %174 = vst [vmem:[%s125_s26] sm:$0xff] (%p42_p3), %v173_v0  ;;  %v179_v3 = vld [vmem:[%s130_s25 + $0x30] sm:$0xff] (%p42_p3) }
  0x15   : > { %176 = vst [vmem:[%s125_s26 + $0x8] sm:$0xff] %v175_v1  ;;  %v181_v4 = vld [vmem:[%s130_s25 + $0x40] sm:$0xff]  ;;  %v183_v5 = vld [vmem:[%s130_s25 + $0x50] sm:$0xff] }
  0x16   : > { %178 = vst [vmem:[%s125_s26 + $0x10] sm:$0xff] %v177_v2  ;;  %v185_v6 = vld [vmem:[%s130_s25 + $0x60] sm:$0xff]  ;;  %v187_v7 = vld [vmem:[%s130_s25 + $0x70] sm:$0xff] }
  0x17   : > { %180 = vst [vmem:[%s125_s26 + $0x18] sm:$0xff] %v179_v3 }
  0x18   : > { %182 = vst [vmem:[%s125_s26 + $0x20] sm:$0xff] %v181_v4 }
  0x19   : > { %184 = vst [vmem:[%s125_s26 + $0x28] sm:$0xff] %v183_v5 }
  0x1a   : > { %186 = vst [vmem:[%s125_s26 + $0x30] sm:$0xff] %v185_v6 }
  0x1b   : > { %188 = vst [vmem:[%s125_s26 + $0x38] sm:$0xff] %v187_v7 }
  0x1c PF: > { %p1176_p8 = scmp.ge.s32.totalorder %s1279_s13, 1  ;;  %p193_p9 = scmp.lt.s32.totalorder %s1279_s13, 3 }
  0x1e   : > { %p194_p10 = pnand %p1176_p8, %p193_p9 }
  0x1f   : > { %s200_s27 = sand.u32 (!%p194_p10), 1, %s1263_s9   ;;  %p1179_p11 = scmp.ne.s32.totalorder (!%p194_p10), %s1271_s11, 0 }
  0x20   : > { %197 = sbr.rel (%p194_p10) target bundleno = 1198 (0x4ae), region = 62  ;;  %s1177_s28 = sshll.u32 (!%p194_p10), %s200_s27, 6 }
  0x21   : > { %s1348_s29 = scalar_lea.vmem (!%p194_p10), [#allocation3], %s1177_s28  ;;  %s1350_s30 = scalar_lea.vmem (!%p194_p10), [#allocation4], %s1177_s28 }
  0x25   : > { %225 = sbr.rel (%p1179_p11) target bundleno = 44 (0x2c), region = 70 }
  0x2a   : > { %v1281_v8 = vmov 0.0  }
  0x2b   : > { %226 = vst [vmem:[#allocation2] sm:$0xff] %v1281_v8 }
  0x2c PF: > { %v1356_v9 = vld [vmem:[%s1983_s1 + $0x78] sm:$0xff]  ;;  %v1366_v11 = vld [vmem:[%s1983_s1 + $0x70] sm:$0xff]  ;;  %v1378_v13 = vld [vmem:[%s1983_s1 + $0x68] sm:$0xff]  ;;  %vm277_vm0 = vcmask 1041409   ;;  %vm280_vm1 = vcmask 1042434   ;;  %vm283_vm2 = vcmask 1043459  }
  0x2d   : > { %v1361_v10 = vld [vmem:[%s1983_s1 + $0xf8] sm:$0xff]  ;;  %298 = vmatpush.msra.mxu0 %v1356_v9  ;;  %v1373_v12 = vld [vmem:[%s1983_s1 + $0xf0] sm:$0xff]  ;;  %v1383_v14 = vld [vmem:[%s1983_s1 + $0xe8] sm:$0xff]  ;;  %393 = vmatpush.msra.mxu2 %v1356_v9  ;;  %vm286_vm3 = vcmask 1044484   ;;  %vm289_vm4 = vcmask 1045509   ;;  %vm292_vm5 = vcmask 1046534  }
  0x2e   : > { %318 = vmatpush.msra.mxu1 %v1361_v10  ;;  %413 = vmatpush.msra.mxu3 %v1361_v10  ;;  %v1392_v15 = vld [vmem:[%s1983_s1 + $0x60] sm:$0xff]  ;;  %v1406_v17 = vld [vmem:[%s1983_s1 + $0x58] sm:$0xff]  ;;  %v1420_v19 = vld [vmem:[%s1983_s1 + $0x50] sm:$0xff]  ;;  %vm295_vm6 = vcmask 1047559  }
  0x2f   : > { %299 = vmatpush.msra.mxu0 %v1366_v11  ;;  %v1397_v16 = vld [vmem:[%s1983_s1 + $0xe0] sm:$0xff]  ;;  %394 = vmatpush.msra.mxu2 %v1366_v11  ;;  %v1411_v18 = vld [vmem:[%s1983_s1 + $0xd8] sm:$0xff]  ;;  %v1425_v20 = vld [vmem:[%s1983_s1 + $0xd0] sm:$0xff] }
  0x30   : > { %319 = vmatpush.msra.mxu1 %v1373_v12  ;;  %414 = vmatpush.msra.mxu3 %v1373_v12  ;;  %v1434_v21 = vld [vmem:[%s1983_s1 + $0x48] sm:$0xff]  ;;  %v261_v23 = vld [vmem:[%s1348_s29 + $0x8] sm:$0x1]  ;;  %v262_v24 = vld [vmem:[%s1348_s29 + $0x10] sm:$0x1] }
  0x31   : > { %300 = vmatpush.msra.mxu0 %v1378_v13  ;;  %395 = vmatpush.msra.mxu2 %v1378_v13  ;;  %v1439_v22 = vld [vmem:[%s1983_s1 + $0xc8] sm:$0xff]  ;;  %v263_v25 = vld [vmem:[%s1348_s29 + $0x18] sm:$0x1]  ;;  %v276_v30 = vrot.slane %v261_v23, 7  ;;  %v279_v31 = vrot.slane %v262_v24, 6  ;;  %v1467_v33 = vld [vmem:[%s1983_s1 + $0x38] sm:$0xff] }
  0x32   : > { %320 = vmatpush.msra.mxu1 %v1383_v14  ;;  %415 = vmatpush.msra.mxu3 %v1383_v14  ;;  %v1451_v26 = vld [vmem:[%s1983_s1 + $0x40] sm:$0xff]  ;;  %v260_v28 = vld [vmem:[%s1348_s29] sm:$0x1]  ;;  %v282_v32 = vrot.slane %v263_v25, 5  ;;  %v1472_v34 = vld [vmem:[%s1983_s1 + $0xb8] sm:$0xff] }
  0x33   : > { %301 = vmatpush.msra.mxu0 %v1392_v15  ;;  %396 = vmatpush.msra.mxu2 %v1392_v15  ;;  %v1456_v27 = vld [vmem:[%s1983_s1 + $0xc0] sm:$0xff]  ;;  %v264_v29 = vld [vmem:[%s1348_s29 + $0x20] sm:$0x1]  ;;  %v278_v35 = vsel %vm277_vm0, %v276_v30, %v260_v28  ;;  %v1482_v36 = vld [vmem:[%s1983_s1 + $0x30] sm:$0xff] }
  0x34   : > { %321 = vmatpush.msra.mxu1 %v1397_v16  ;;  %416 = vmatpush.msra.mxu3 %v1397_v16  ;;  %v1487_v37 = vld [vmem:[%s1983_s1 + $0xb0] sm:$0xff]  ;;  %v281_v39 = vsel %vm280_vm1, %v279_v31, %v278_v35  ;;  %v285_v40 = vrot.slane %v264_v29, 4  ;;  %v1499_v42 = vld [vmem:[%s1983_s1 + $0x28] sm:$0xff]  ;;  %v266_v44 = vld [vmem:[%s1348_s29 + $0x30] sm:$0x1] }
  0x35   : > { %302 = vmatpush.msra.mxu0 %v1406_v17  ;;  %397 = vmatpush.msra.mxu2 %v1406_v17  ;;  %v265_v38 = vld [vmem:[%s1348_s29 + $0x28] sm:$0x1]  ;;  %v284_v41 = vsel %vm283_vm2, %v282_v32, %v281_v39  ;;  %v1504_v43 = vld [vmem:[%s1983_s1 + $0xa8] sm:$0xff]  ;;  %v1514_v46 = vld [vmem:[%s1983_s1 + $0x20] sm:$0xff]  ;;  %v291_v52 = vrot.slane %v266_v44, 2 }
  0x36   : > { %322 = vmatpush.msra.mxu1 %v1411_v18  ;;  %417 = vmatpush.msra.mxu3 %v1411_v18  ;;  %v288_v45 = vrot.slane %v265_v38, 3  ;;  %v1519_v47 = vld [vmem:[%s1983_s1 + $0xa0] sm:$0xff]  ;;  %v287_v48 = vsel %vm286_vm3, %v285_v40, %v284_v41  ;;  %v1529_v49 = vld [vmem:[%s1983_s1 + $0x18] sm:$0xff]  ;;  %v1545_v54 = vld [vmem:[%s1983_s1 + $0x10] sm:$0xff] }
  0x37   : > { %303 = vmatpush.msra.mxu0 %v1420_v19  ;;  %398 = vmatpush.msra.mxu2 %v1420_v19  ;;  %v1534_v50 = vld [vmem:[%s1983_s1 + $0x98] sm:$0xff]  ;;  %v267_v51 = vld [vmem:[%s1348_s29 + $0x38] sm:$0x1]  ;;  %v1550_v55 = vld [vmem:[%s1983_s1 + $0x90] sm:$0xff] }
  0x38   : > { %323 = vmatpush.msra.mxu1 %v1425_v20  ;;  %418 = vmatpush.msra.mxu3 %v1425_v20  ;;  %v290_v53 = vsel %vm289_vm4, %v288_v45, %v287_v48  ;;  %v294_v56 = vrot.slane %v267_v51, 1  ;;  %v1559_v57 = vld [vmem:[%s1983_s1 + $0x8] sm:$0xff]  ;;  %v1574_v60 = vld [vmem:[%s1983_s1] sm:$0xff]  ;;  %v363_v0 = vld [vmem:[%s1348_s29 + $0x9] sm:$0x1] }
  0x39   : > { %304 = vmatpush.msra.mxu0 %v1434_v21  ;;  %399 = vmatpush.msra.mxu2 %v1434_v21  ;;  %v1564_v58 = vld [vmem:[%s1983_s1 + $0x88] sm:$0xff]  ;;  %v293_v59 = vsel %vm292_vm5, %v291_v52, %v290_v53  ;;  %v1579_v61 = vld [vmem:[%s1983_s1 + $0x80] sm:$0xff]  ;;  %v364_v1 = vld [vmem:[%s1348_s29 + $0x11] sm:$0x1]  ;;  %v378_v2 = vrot.slane %v363_v0, 7 }
  0x3a   : > { %324 = vmatpush.msra.mxu1 %v1439_v22  ;;  %419 = vmatpush.msra.mxu3 %v1439_v22  ;;  %v296_v62 = vsel %vm295_vm6, %v294_v56, %v293_v59  ;;  %v259_v63 = vld [vmem:[#allocation2] sm:$0xff]  ;;  %v362_v3 = vld [vmem:[%s1348_s29 + $0x1] sm:$0x1]  ;;  %v380_v5 = vrot.slane %v364_v1, 6  ;;  %v367_v23 = vld [vmem:[%s1348_s29 + $0x29] sm:$0x1] }
  0x3b   : > { %305 = vmatpush.msra.mxu0 %v1451_v26  ;;  %400 = vmatpush.msra.mxu2 %v1451_v26  ;;  %v365_v4 = vld [vmem:[%s1348_s29 + $0x19] sm:$0x1]  ;;  %v366_v6 = vld [vmem:[%s1348_s29 + $0x21] sm:$0x1]  ;;  %v379_v7 = vsel %vm277_vm0, %v378_v2, %v362_v3  ;;  %v368_v28 = vld [vmem:[%s1348_s29 + $0x31] sm:$0x1] }
  0x3c   : > { %325 = vmatpush.msra.mxu1 %v1456_v27  ;;  %420 = vmatpush.msra.mxu3 %v1456_v27  ;;  %v382_v8 = vrot.slane %v365_v4, 5  ;;  %v381_v24 = vsel %vm280_vm1, %v380_v5, %v379_v7  ;;  %v384_v25 = vrot.slane %v366_v6, 4  ;;  %v386_v30 = vrot.slane %v367_v23, 3  ;;  %v369_v31 = vld [vmem:[%s1348_s29 + $0x39] sm:$0x1] }
  0x3d   : > { %306 = vmatpush.msra.mxu0 %v1467_v33  ;;  %401 = vmatpush.msra.mxu2 %v1467_v33  ;;  %v388_v35 = vrot.slane %v368_v28, 2  ;;  %v390_v39 = vrot.slane %v369_v31, 1  ;;  %v458_v1 = vld [vmem:[%s1348_s29 + $0xa] sm:$0x1]  ;;  %v459_v2 = vld [vmem:[%s1348_s29 + $0x12] sm:$0x1] }
  0x3e   : > { %326 = vmatpush.msra.mxu1 %v1472_v34  ;;  %421 = vmatpush.msra.mxu3 %v1472_v34  ;;  %v383_v29 = vsel %vm283_vm2, %v382_v8, %v381_v24  ;;  %v473_v3 = vrot.slane %v458_v1, 7  ;;  %v457_v4 = vld [vmem:[%s1348_s29 + $0x2] sm:$0x1]  ;;  %v460_v5 = vld [vmem:[%s1348_s29 + $0x1a] sm:$0x1]  ;;  %v475_v6 = vrot.slane %v459_v2, 6 }
  0x3f   : > { %307 = vmatpush.msra.mxu0 %v1482_v36  ;;  %402 = vmatpush.msra.mxu2 %v1482_v36  ;;  %v385_v32 = vsel %vm286_vm3, %v384_v25, %v383_v29  ;;  %v461_v7 = vld [vmem:[%s1348_s29 + $0x22] sm:$0x1]  ;;  %v477_v23 = vrot.slane %v460_v5, 5  ;;  %v462_v24 = vld [vmem:[%s1348_s29 + $0x2a] sm:$0x1] }
  0x40   : > { %327 = vmatpush.msra.mxu1 %v1487_v37  ;;  %422 = vmatpush.msra.mxu3 %v1487_v37  ;;  %v387_v38 = vsel %vm289_vm4, %v386_v30, %v385_v32  ;;  %v474_v8 = vsel %vm277_vm0, %v473_v3, %v457_v4  ;;  %v479_v28 = vrot.slane %v461_v7, 4  ;;  %v463_v29 = vld [vmem:[%s1348_s29 + $0x32] sm:$0x1]  ;;  %v481_v31 = vrot.slane %v462_v24, 3  ;;  %v464_v32 = vld [vmem:[%s1348_s29 + $0x3a] sm:$0x1] }
  0x41   : > { %308 = vmatpush.msra.mxu0 %v1499_v42  ;;  %403 = vmatpush.msra.mxu2 %v1499_v42  ;;  %v389_v40 = vsel %vm292_vm5, %v388_v35, %v387_v38  ;;  %v476_v25 = vsel %vm280_vm1, %v475_v6, %v474_v8  ;;  %v483_v38 = vrot.slane %v463_v29, 2  ;;  %v553_v2 = vld [vmem:[%s1348_s29 + $0xb] sm:$0x1]  ;;  %v554_v3 = vld [vmem:[%s1348_s29 + $0x13] sm:$0x1] }
  0x42   : > { %328 = vmatpush.msra.mxu1 %v1504_v43  ;;  %423 = vmatpush.msra.mxu3 %v1504_v43  ;;  %v391_v41 = vsel %vm295_vm6, %v390_v39, %v389_v40  ;;  %v478_v30 = vsel %vm283_vm2, %v477_v23, %v476_v25  ;;  %v485_v40 = vrot.slane %v464_v32, 1  ;;  %v568_v4 = vrot.slane %v553_v2, 7  ;;  %v552_v5 = vld [vmem:[%s1348_s29 + $0x3] sm:$0x1]  ;;  %v555_v6 = vld [vmem:[%s1348_s29 + $0x1b] sm:$0x1] }
  0x43   : > { %309 = vmatpush.msra.mxu0 %v1514_v46  ;;  %404 = vmatpush.msra.mxu2 %v1514_v46  ;;  %v480_v35 = vsel %vm286_vm3, %v479_v28, %v478_v30  ;;  %v570_v7 = vrot.slane %v554_v3, 6  ;;  %v556_v8 = vld [vmem:[%s1348_s29 + $0x23] sm:$0x1]  ;;  %v572_v24 = vrot.slane %v555_v6, 5  ;;  %v557_v25 = vld [vmem:[%s1348_s29 + $0x2b] sm:$0x1] }
  0x44   : > { %329 = vmatpush.msra.mxu1 %v1519_v47  ;;  %424 = vmatpush.msra.mxu3 %v1519_v47  ;;  %v482_v39 = vsel %vm289_vm4, %v481_v31, %v480_v35  ;;  %v569_v23 = vsel %vm277_vm0, %v568_v4, %v552_v5  ;;  %v574_v29 = vrot.slane %v556_v8, 4  ;;  %v558_v30 = vld [vmem:[%s1348_s29 + $0x33] sm:$0x1]  ;;  %v576_v32 = vrot.slane %v557_v25, 3  ;;  %v559_v35 = vld [vmem:[%s1348_s29 + $0x3b] sm:$0x1] }
  0x45   : > { %310 = vmatpush.msra.mxu0 %v1529_v49  ;;  %405 = vmatpush.msra.mxu2 %v1529_v49  ;;  %v571_v28 = vsel %vm280_vm1, %v570_v7, %v569_v23  ;;  %v743_v4 = vld [vmem:[%s1348_s29 + $0xd] sm:$0x1]  ;;  %v744_v5 = vld [vmem:[%s1348_s29 + $0x15] sm:$0x1]  ;;  %v742_v7 = vld [vmem:[%s1348_s29 + $0x5] sm:$0x1] }
  0x46   : > { %330 = vmatpush.msra.mxu1 %v1534_v50  ;;  %425 = vmatpush.msra.mxu3 %v1534_v50  ;;  %v573_v31 = vsel %vm283_vm2, %v572_v24, %v571_v28  ;;  %v758_v6 = vrot.slane %v743_v4, 7  ;;  %v745_v8 = vld [vmem:[%s1348_s29 + $0x1d] sm:$0x1]  ;;  %v760_v23 = vrot.slane %v744_v5, 6  ;;  %v746_v24 = vld [vmem:[%s1348_s29 + $0x25] sm:$0x1] }
  0x47   : > { %311 = vmatpush.msra.mxu0 %v1545_v54  ;;  %406 = vmatpush.msra.mxu2 %v1545_v54  ;;  %v762_v28 = vrot.slane %v745_v8, 5 }
  0x48   : > { %331 = vmatpush.msra.mxu1 %v1550_v55  ;;  %426 = vmatpush.msra.mxu3 %v1550_v55  ;;  %v759_v25 = vsel %vm277_vm0, %v758_v6, %v742_v7  ;;  %v933_v6 = vld [vmem:[%s1348_s29 + $0xf] sm:$0x1]  ;;  %v934_v7 = vld [vmem:[%s1348_s29 + $0x17] sm:$0x1] }
  0x49   : > { %312 = vmatpush.msra.mxu0 %v1559_v57  ;;  %407 = vmatpush.msra.mxu2 %v1559_v57  ;;  %v948_v8 = vrot.slane %v933_v6, 7 }
  0x4a   : > { %332 = vmatpush.msra.mxu1 %v1564_v58  ;;  %427 = vmatpush.msra.mxu3 %v1564_v58 }
  0x4b   : > { %313 = vmatpush.msra.mxu0 %v1574_v60  ;;  %408 = vmatpush.msra.mxu2 %v1574_v60 }
  0x4c   : > { %333 = vmatpush.msra.mxu1 %v1579_v61  ;;  %314 = vmatmul.f32.vlgmr.msra.gmra.mxu0 %v296_v62 }
  0x4d   : > { %334 = vmatmul.f32.vlgmr.msra.gmra.mxu1 %v259_v63  ;;  %428 = vmatpush.msra.mxu3 %v1579_v61 }
  0x4e   : > { %488 = vmatpush.msrb.mxu0 %v1356_v9  ;;  %508 = vmatpush.msrb.mxu1 %v1361_v10 }
  0x4f   : > { %583 = vmatpush.msrb.mxu2 %v1356_v9  ;;  %603 = vmatpush.msrb.mxu3 %v1361_v10 }
  0x50   : > { %489 = vmatpush.msrb.mxu0 %v1366_v11  ;;  %509 = vmatpush.msrb.mxu1 %v1373_v12 }
  0x51   : > { %584 = vmatpush.msrb.mxu2 %v1366_v11  ;;  %604 = vmatpush.msrb.mxu3 %v1373_v12 }
  0x52   : > { %490 = vmatpush.msrb.mxu0 %v1378_v13  ;;  %510 = vmatpush.msrb.mxu1 %v1383_v14 }
  0x53   : > { %585 = vmatpush.msrb.mxu2 %v1378_v13  ;;  %605 = vmatpush.msrb.mxu3 %v1383_v14 }
  0x54   : > { %491 = vmatpush.msrb.mxu0 %v1392_v15  ;;  %511 = vmatpush.msrb.mxu1 %v1397_v16 }
  0x55   : > { %586 = vmatpush.msrb.mxu2 %v1392_v15  ;;  %606 = vmatpush.msrb.mxu3 %v1397_v16 }
  0x56   : > { %492 = vmatpush.msrb.mxu0 %v1406_v17  ;;  %512 = vmatpush.msrb.mxu1 %v1411_v18 }
  0x57   : > { %587 = vmatpush.msrb.mxu2 %v1406_v17  ;;  %607 = vmatpush.msrb.mxu3 %v1411_v18 }
  0x58   : > { %493 = vmatpush.msrb.mxu0 %v1420_v19  ;;  %513 = vmatpush.msrb.mxu1 %v1425_v20 }
  0x59   : > { %588 = vmatpush.msrb.mxu2 %v1420_v19  ;;  %608 = vmatpush.msrb.mxu3 %v1425_v20 }
  0x5a   : > { %494 = vmatpush.msrb.mxu0 %v1434_v21  ;;  %514 = vmatpush.msrb.mxu1 %v1439_v22 }
  0x5b   : > { %589 = vmatpush.msrb.mxu2 %v1434_v21  ;;  %609 = vmatpush.msrb.mxu3 %v1439_v22 }
  0x5c   : > { %495 = vmatpush.msrb.mxu0 %v1451_v26  ;;  %515 = vmatpush.msrb.mxu1 %v1456_v27 }
  0x5d   : > { %590 = vmatpush.msrb.mxu2 %v1451_v26  ;;  %610 = vmatpush.msrb.mxu3 %v1456_v27 }
  0x5e   : > { %496 = vmatpush.msrb.mxu0 %v1467_v33  ;;  %516 = vmatpush.msrb.mxu1 %v1472_v34 }
  0x5f   : > { %591 = vmatpush.msrb.mxu2 %v1467_v33  ;;  %611 = vmatpush.msrb.mxu3 %v1472_v34 }
  0x60   : > { %497 = vmatpush.msrb.mxu0 %v1482_v36  ;;  %517 = vmatpush.msrb.mxu1 %v1487_v37 }
  0x61   : > { %592 = vmatpush.msrb.mxu2 %v1482_v36  ;;  %612 = vmatpush.msrb.mxu3 %v1487_v37 }
  0x62   : > { %498 = vmatpush.msrb.mxu0 %v1499_v42  ;;  %518 = vmatpush.msrb.mxu1 %v1504_v43 }
  0x63   : > { %593 = vmatpush.msrb.mxu2 %v1499_v42  ;;  %613 = vmatpush.msrb.mxu3 %v1504_v43 }
  0x64   : > { %499 = vmatpush.msrb.mxu0 %v1514_v46  ;;  %519 = vmatpush.msrb.mxu1 %v1519_v47 }
  0x65   : > { %594 = vmatpush.msrb.mxu2 %v1514_v46  ;;  %614 = vmatpush.msrb.mxu3 %v1519_v47 }
  0x66   : > { %500 = vmatpush.msrb.mxu0 %v1529_v49  ;;  %520 = vmatpush.msrb.mxu1 %v1534_v50 }
  0x67   : > { %595 = vmatpush.msrb.mxu2 %v1529_v49  ;;  %615 = vmatpush.msrb.mxu3 %v1534_v50 }
  0x68   : > { %501 = vmatpush.msrb.mxu0 %v1545_v54  ;;  %521 = vmatpush.msrb.mxu1 %v1550_v55 }
  0x69   : > { %596 = vmatpush.msrb.mxu2 %v1545_v54  ;;  %616 = vmatpush.msrb.mxu3 %v1550_v55 }
  0x6a   : > { %502 = vmatpush.msrb.mxu0 %v1559_v57  ;;  %522 = vmatpush.msrb.mxu1 %v1564_v58 }
  0x6b   : > { %597 = vmatpush.msrb.mxu2 %v1559_v57  ;;  %617 = vmatpush.msrb.mxu3 %v1564_v58 }
  0x6c   : > { %503 = vmatpush.msrb.mxu0 %v1574_v60  ;;  %523 = vmatpush.msrb.mxu1 %v1579_v61 }
  0x6d   : > { %598 = vmatpush.msrb.mxu2 %v1574_v60  ;;  %618 = vmatpush.msrb.mxu3 %v1579_v61 }
  0x6e   : > { %678 = vmatpush.msra.mxu0 %v1356_v9  ;;  %698 = vmatpush.msra.mxu1 %v1361_v10 }
  0x6f   : > { %409 = vmatmul.f32.vlgmr.msra.gmra.mxu2 %v391_v41  ;;  %v484_v41 = vsel %vm292_vm5, %v483_v38, %v482_v39  ;;  %v575_v38 = vsel %vm286_vm3, %v574_v29, %v573_v31  ;;  %v578_v39 = vrot.slane %v558_v30, 2  ;;  %v747_v29 = vld [vmem:[%s1348_s29 + $0x2d] sm:$0x1]  ;;  %v761_v30 = vsel %vm280_vm1, %v760_v23, %v759_v25  ;;  %v932_v23 = vld [vmem:[%s1348_s29 + $0x7] sm:$0x1] }
  0x70   : > { %679 = vmatpush.msra.mxu0 %v1366_v11  ;;  %699 = vmatpush.msra.mxu1 %v1373_v12  ;;  %v764_v31 = vrot.slane %v746_v24, 4  ;;  %v935_v24 = vld [vmem:[%s1348_s29 + $0x1f] sm:$0x1]  ;;  %v950_v25 = vrot.slane %v934_v7, 6 }
  0x71   : > { %773 = vmatpush.msra.mxu2 %v1356_v9 }
  0x72   : > { %680 = vmatpush.msra.mxu0 %v1378_v13  ;;  %700 = vmatpush.msra.mxu1 %v1383_v14 }
  0x73   : > { %774 = vmatpush.msra.mxu2 %v1366_v11 }
  0x74   : > { %681 = vmatpush.msra.mxu0 %v1392_v15  ;;  %701 = vmatpush.msra.mxu1 %v1397_v16 }
  0x75   : > { %775 = vmatpush.msra.mxu2 %v1378_v13 }
  0x76   : > { %682 = vmatpush.msra.mxu0 %v1406_v17  ;;  %702 = vmatpush.msra.mxu1 %v1411_v18 }
  0x77   : > { %776 = vmatpush.msra.mxu2 %v1392_v15 }
  0x78   : > { %683 = vmatpush.msra.mxu0 %v1420_v19  ;;  %703 = vmatpush.msra.mxu1 %v1425_v20 }
  0x79   : > { %777 = vmatpush.msra.mxu2 %v1406_v17 }
  0x7a   : > { %684 = vmatpush.msra.mxu0 %v1434_v21  ;;  %704 = vmatpush.msra.mxu1 %v1439_v22 }
  0x7b   : > { %778 = vmatpush.msra.mxu2 %v1420_v19 }
  0x7c   : > { %685 = vmatpush.msra.mxu0 %v1451_v26  ;;  %705 = vmatpush.msra.mxu1 %v1456_v27 }
  0x7d   : > { %779 = vmatpush.msra.mxu2 %v1434_v21 }
  0x7e   : > { %686 = vmatpush.msra.mxu0 %v1467_v33  ;;  %706 = vmatpush.msra.mxu1 %v1472_v34 }
  0x7f   : > { %780 = vmatpush.msra.mxu2 %v1451_v26 }
  0x80   : > { %687 = vmatpush.msra.mxu0 %v1482_v36  ;;  %707 = vmatpush.msra.mxu1 %v1487_v37 }
  0x81   : > { %781 = vmatpush.msra.mxu2 %v1467_v33 }
  0x82   : > { %688 = vmatpush.msra.mxu0 %v1499_v42  ;;  %708 = vmatpush.msra.mxu1 %v1504_v43 }
  0x83   : > { %782 = vmatpush.msra.mxu2 %v1482_v36 }
  0x84   : > { %689 = vmatpush.msra.mxu0 %v1514_v46  ;;  %709 = vmatpush.msra.mxu1 %v1519_v47 }
  0x85   : > { %783 = vmatpush.msra.mxu2 %v1499_v42 }
  0x86   : > { %690 = vmatpush.msra.mxu0 %v1529_v49  ;;  %710 = vmatpush.msra.mxu1 %v1534_v50 }
  0x87   : > { %784 = vmatpush.msra.mxu2 %v1514_v46 }
  0x88   : > { %691 = vmatpush.msra.mxu0 %v1545_v54  ;;  %711 = vmatpush.msra.mxu1 %v1550_v55 }
  0x89   : > { %785 = vmatpush.msra.mxu2 %v1529_v49 }
  0x8a   : > { %692 = vmatpush.msra.mxu0 %v1559_v57  ;;  %712 = vmatpush.msra.mxu1 %v1564_v58 }
  0x8b   : > { %786 = vmatpush.msra.mxu2 %v1545_v54 }
  0x8c   : > { %693 = vmatpush.msra.mxu0 %v1574_v60  ;;  %713 = vmatpush.msra.mxu1 %v1579_v61 }
  0x8d   : > { %787 = vmatpush.msra.mxu2 %v1559_v57 }
  0x8f   : > { %788 = vmatpush.msra.mxu2 %v1574_v60 }
  0xc9   : > { %v315_v44 = vpop.f32.mrf.mxu0 }
  0xca   : > { %v335_v45 = vpop.f32.mrf.mxu1 }
  0xcb   : > { %v336_v48 = vadd.f32 %v335_v45, %v315_v44  ;;  %v486_v44 = vsel %vm295_vm6, %v485_v40, %v484_v41  ;;  %v577_v40 = vsel %vm289_vm4, %v576_v32, %v575_v38  ;;  %v580_v41 = vrot.slane %v559_v35, 1  ;;  %v748_v32 = vld [vmem:[%s1348_s29 + $0x35] sm:$0x1] }
  0xcc   : > { %504 = vmatmul.f32.vlgmr.msrb.gmra.mxu0 %v486_v44  ;;  %v579_v44 = vsel %vm292_vm5, %v578_v39, %v577_v40  ;;  %v763_v35 = vsel %vm283_vm2, %v762_v28, %v761_v30  ;;  %v766_v38 = vrot.slane %v747_v29, 3  ;;  %v749_v39 = vld [vmem:[%s1348_s29 + $0x3d] sm:$0x1]  ;;  %v936_v28 = vld [vmem:[%s1348_s29 + $0x27] sm:$0x1]  ;;  %v949_v29 = vsel %vm277_vm0, %v948_v8, %v932_v23 }
  0xcd   : > { %1225 = vtanh.f32 %v336_v48  ;;  %868 = vmatpush.msrb.mxu0 %v1356_v9  ;;  %v765_v40 = vsel %vm286_vm3, %v764_v31, %v763_v35  ;;  %v952_v30 = vrot.slane %v935_v24, 5  ;;  %v937_v31 = vld [vmem:[%s1348_s29 + $0x2f] sm:$0x1]  ;;  %v954_v35 = vrot.slane %v936_v28, 4 }
  0xcf   : > { %869 = vmatpush.msrb.mxu0 %v1366_v11 }
  0xd1   : > { %870 = vmatpush.msrb.mxu0 %v1378_v13 }
  0xd3   : > { %v1226_v51 = vpop.eup %1225  ;;  %871 = vmatpush.msrb.mxu0 %v1392_v15 }
  0xd4   : > { %v340_v52 = vrot.slane %v1226_v51, 1  ;;  %v341_v53 = vrot.slane %v1226_v51, 2  ;;  %v342_v56 = vrot.slane %v1226_v51, 3  ;;  %354 = vst [vmem:[%s1350_s30] sm:$0x1] %v1226_v51  ;;  %429 = vmatmul.f32.vlgmr.msra.gmra.mxu3 %v1226_v51  ;;  %v343_v59 = vrot.slane %v1226_v51, 4 }
  0xd5   : > { %793 = vmatpush.msra.mxu3 %v1361_v10  ;;  %v344_v62 = vrot.slane %v1226_v51, 5  ;;  %v345_v63 = vrot.slane %v1226_v51, 6  ;;  %v346_v0 = vrot.slane %v1226_v51, 7  ;;  %872 = vmatpush.msrb.mxu0 %v1406_v17 }
  0xd6   : > { %355 = vst [vmem:[%s1350_s30 + $0x8] sm:$0x1] %v340_v52 }
  0xd7   : > { %356 = vst [vmem:[%s1350_s30 + $0x10] sm:$0x1] %v341_v53  ;;  %794 = vmatpush.msra.mxu3 %v1373_v12  ;;  %873 = vmatpush.msrb.mxu0 %v1420_v19 }
  0xd8   : > { %357 = vst [vmem:[%s1350_s30 + $0x18] sm:$0x1] %v342_v56 }
  0xd9   : > { %358 = vst [vmem:[%s1350_s30 + $0x20] sm:$0x1] %v343_v59  ;;  %795 = vmatpush.msra.mxu3 %v1383_v14  ;;  %874 = vmatpush.msrb.mxu0 %v1434_v21 }
  0xda   : > { %359 = vst [vmem:[%s1350_s30 + $0x28] sm:$0x1] %v344_v62 }
  0xdb   : > { %360 = vst [vmem:[%s1350_s30 + $0x30] sm:$0x1] %v345_v63  ;;  %796 = vmatpush.msra.mxu3 %v1397_v16  ;;  %875 = vmatpush.msrb.mxu0 %v1451_v26 }
  0xdc   : > { %361 = vst [vmem:[%s1350_s30 + $0x38] sm:$0x1] %v346_v0 }
  0xdd   : > { %797 = vmatpush.msra.mxu3 %v1411_v18  ;;  %876 = vmatpush.msrb.mxu0 %v1467_v33 }
  0xdf   : > { %798 = vmatpush.msra.mxu3 %v1425_v20  ;;  %877 = vmatpush.msrb.mxu0 %v1482_v36 }
  0xe1   : > { %799 = vmatpush.msra.mxu3 %v1439_v22  ;;  %878 = vmatpush.msrb.mxu0 %v1499_v42 }
  0xe3   : > { %800 = vmatpush.msra.mxu3 %v1456_v27  ;;  %879 = vmatpush.msrb.mxu0 %v1514_v46 }
  0xe5   : > { %801 = vmatpush.msra.mxu3 %v1472_v34  ;;  %880 = vmatpush.msrb.mxu0 %v1529_v49 }
  0xe7   : > { %802 = vmatpush.msra.mxu3 %v1487_v37  ;;  %881 = vmatpush.msrb.mxu0 %v1545_v54 }
  0xe9   : > { %803 = vmatpush.msra.mxu3 %v1504_v43  ;;  %882 = vmatpush.msrb.mxu0 %v1559_v57 }
  0xeb   : > { %804 = vmatpush.msra.mxu3 %v1519_v47  ;;  %883 = vmatpush.msrb.mxu0 %v1574_v60 }
  0xed   : > { %805 = vmatpush.msra.mxu3 %v1534_v50 }
  0xef   : > { %806 = vmatpush.msra.mxu3 %v1550_v55 }
  0xf1   : > { %807 = vmatpush.msra.mxu3 %v1564_v58 }
  0xf2   : > { %v410_v45 = vpop.f32.mrf.mxu2 }
  0xf3   : > { %808 = vmatpush.msra.mxu3 %v1579_v61 }
 0x157   : > { %v430_v48 = vpop.f32.mrf.mxu3 }
 0x158   : > { %v431_v51 = vadd.f32 %v430_v48, %v410_v45  ;;  %v581_v45 = vsel %vm295_vm6, %v580_v41, %v579_v44  ;;  %v505_v48 = vpop.f32.mrf.mxu0  ;;  %v768_v41 = vrot.slane %v748_v32, 2  ;;  %v767_v44 = vsel %vm289_vm4, %v766_v38, %v765_v40  ;;  %v938_v38 = vld [vmem:[%s1348_s29 + $0x37] sm:$0x1] }
 0x159   : > { %599 = vmatmul.f32.vlgmr.msrb.gmra.mxu2 %v581_v45  ;;  %v770_v45 = vrot.slane %v749_v39, 1  ;;  %v951_v32 = vsel %vm280_vm1, %v950_v25, %v949_v29  ;;  %v956_v40 = vrot.slane %v937_v31, 3 }
 0x15a   : > { %1227 = vtanh.f32 %v431_v51  ;;  %963 = vmatpush.msrb.mxu2 %v1356_v9  ;;  %v953_v39 = vsel %vm283_vm2, %v952_v30, %v951_v32 }
 0x15c   : > { %964 = vmatpush.msrb.mxu2 %v1366_v11 }
 0x15e   : > { %965 = vmatpush.msrb.mxu2 %v1378_v13 }
 0x160   : > { %v1228_v52 = vpop.eup %1227  ;;  %966 = vmatpush.msrb.mxu2 %v1392_v15 }
 0x161   : > { %v435_v53 = vrot.slane %v1228_v52, 1  ;;  %v436_v56 = vrot.slane %v1228_v52, 2  ;;  %v437_v59 = vrot.slane %v1228_v52, 3  ;;  %449 = vst [vmem:[%s1350_s30 + $0x1] sm:$0x1] %v1228_v52  ;;  %524 = vmatmul.f32.vlgmr.msrb.gmra.mxu1 %v1228_v52  ;;  %v438_v62 = vrot.slane %v1228_v52, 4 }
 0x162   : > { %888 = vmatpush.msrb.mxu1 %v1361_v10  ;;  %v439_v63 = vrot.slane %v1228_v52, 5  ;;  %v440_v0 = vrot.slane %v1228_v52, 6  ;;  %v441_v1 = vrot.slane %v1228_v52, 7  ;;  %967 = vmatpush.msrb.mxu2 %v1406_v17 }
 0x163   : > { %450 = vst [vmem:[%s1350_s30 + $0x9] sm:$0x1] %v435_v53 }
 0x164   : > { %451 = vst [vmem:[%s1350_s30 + $0x11] sm:$0x1] %v436_v56  ;;  %889 = vmatpush.msrb.mxu1 %v1373_v12  ;;  %968 = vmatpush.msrb.mxu2 %v1420_v19 }
 0x165   : > { %452 = vst [vmem:[%s1350_s30 + $0x19] sm:$0x1] %v437_v59 }
 0x166   : > { %453 = vst [vmem:[%s1350_s30 + $0x21] sm:$0x1] %v438_v62  ;;  %890 = vmatpush.msrb.mxu1 %v1383_v14  ;;  %969 = vmatpush.msrb.mxu2 %v1434_v21 }
 0x167   : > { %454 = vst [vmem:[%s1350_s30 + $0x29] sm:$0x1] %v439_v63 }
 0x168   : > { %455 = vst [vmem:[%s1350_s30 + $0x31] sm:$0x1] %v440_v0  ;;  %891 = vmatpush.msrb.mxu1 %v1397_v16  ;;  %970 = vmatpush.msrb.mxu2 %v1451_v26 }
 0x169   : > { %456 = vst [vmem:[%s1350_s30 + $0x39] sm:$0x1] %v441_v1 }
 0x16a   : > { %892 = vmatpush.msrb.mxu1 %v1411_v18  ;;  %971 = vmatpush.msrb.mxu2 %v1467_v33 }
 0x16c   : > { %893 = vmatpush.msrb.mxu1 %v1425_v20  ;;  %972 = vmatpush.msrb.mxu2 %v1482_v36 }
 0x16e   : > { %894 = vmatpush.msrb.mxu1 %v1439_v22  ;;  %973 = vmatpush.msrb.mxu2 %v1499_v42  ;;  %v653_v42 = vld [vmem:[%s1348_s29 + $0x34] sm:$0x1] }
 0x170   : > { %895 = vmatpush.msrb.mxu1 %v1456_v27  ;;  %974 = vmatpush.msrb.mxu2 %v1514_v46 }
 0x172   : > { %896 = vmatpush.msrb.mxu1 %v1472_v34  ;;  %975 = vmatpush.msrb.mxu2 %v1529_v49 }
 0x174   : > { %897 = vmatpush.msrb.mxu1 %v1487_v37  ;;  %976 = vmatpush.msrb.mxu2 %v1545_v54 }
 0x176   : > { %898 = vmatpush.msrb.mxu1 %v1504_v43  ;;  %977 = vmatpush.msrb.mxu2 %v1559_v57 }
 0x178   : > { %899 = vmatpush.msrb.mxu1 %v1519_v47  ;;  %978 = vmatpush.msrb.mxu2 %v1574_v60 }
 0x17a   : > { %900 = vmatpush.msrb.mxu1 %v1534_v50 }
 0x17c   : > { %901 = vmatpush.msrb.mxu1 %v1550_v55 }
 0x17e   : > { %902 = vmatpush.msrb.mxu1 %v1564_v58 }
 0x180   : > { %903 = vmatpush.msrb.mxu1 %v1579_v61 }
 0x1dc   : > { %v600_v60 = vpop.f32.mrf.mxu2 }
 0x1de   : > { %v525_v51 = vpop.f32.mrf.mxu1 }
 0x1df   : > { %v526_v52 = vadd.f32 %v525_v51, %v505_v48  ;;  %v769_v48 = vsel %vm292_vm5, %v768_v41, %v767_v44  ;;  %v939_v41 = vld [vmem:[%s1348_s29 + $0x3f] sm:$0x1]  ;;  %v955_v44 = vsel %vm286_vm3, %v954_v35, %v953_v39 }
 0x1e0   : > { %v771_v51 = vsel %vm295_vm6, %v770_v45, %v769_v48  ;;  %v958_v45 = vrot.slane %v938_v38, 2  ;;  %v957_v48 = vsel %vm289_vm4, %v956_v40, %v955_v44 }
 0x1e1   : > { %1229 = vtanh.f32 %v526_v52  ;;  %789 = vmatmul.f32.vlgmr.msra.gmra.mxu2 %v771_v51  ;;  %v960_v51 = vrot.slane %v939_v41, 1 }
 0x1e7   : > { %v1230_v9 = vpop.eup %1229 }
 0x1e8   : > { %v530_v11 = vrot.slane %v1230_v9, 1  ;;  %v531_v13 = vrot.slane %v1230_v9, 2  ;;  %v532_v15 = vrot.slane %v1230_v9, 3  ;;  %544 = vst [vmem:[%s1350_s30 + $0x2] sm:$0x1] %v1230_v9  ;;  %619 = vmatmul.f32.vlgmr.msrb.gmra.mxu3 %v1230_v9  ;;  %v533_v17 = vrot.slane %v1230_v9, 4 }
 0x1e9   : > { %983 = vmatpush.msrb.mxu3 %v1361_v10  ;;  %v534_v19 = vrot.slane %v1230_v9, 5  ;;  %v535_v21 = vrot.slane %v1230_v9, 6  ;;  %v536_v26 = vrot.slane %v1230_v9, 7  ;;  %v648_v10 = vld [vmem:[%s1348_s29 + $0xc] sm:$0x1] }
 0x1ea   : > { %545 = vst [vmem:[%s1350_s30 + $0xa] sm:$0x1] %v530_v11 }
 0x1eb   : > { %546 = vst [vmem:[%s1350_s30 + $0x12] sm:$0x1] %v531_v13  ;;  %984 = vmatpush.msrb.mxu3 %v1373_v12  ;;  %v649_v12 = vld [vmem:[%s1348_s29 + $0x14] sm:$0x1] }
 0x1ec   : > { %547 = vst [vmem:[%s1350_s30 + $0x1a] sm:$0x1] %v532_v15 }
 0x1ed   : > { %548 = vst [vmem:[%s1350_s30 + $0x22] sm:$0x1] %v533_v17  ;;  %985 = vmatpush.msrb.mxu3 %v1383_v14  ;;  %v663_v14 = vrot.slane %v648_v10, 7 }
 0x1ee   : > { %549 = vst [vmem:[%s1350_s30 + $0x2a] sm:$0x1] %v534_v19 }
 0x1ef   : > { %550 = vst [vmem:[%s1350_s30 + $0x32] sm:$0x1] %v535_v21  ;;  %986 = vmatpush.msrb.mxu3 %v1397_v16  ;;  %v647_v16 = vld [vmem:[%s1348_s29 + $0x4] sm:$0x1] }
 0x1f0   : > { %551 = vst [vmem:[%s1350_s30 + $0x3a] sm:$0x1] %v536_v26 }
 0x1f1   : > { %987 = vmatpush.msrb.mxu3 %v1411_v18  ;;  %v650_v18 = vld [vmem:[%s1348_s29 + $0x1c] sm:$0x1] }
 0x1f2   : > { %v667_v33 = vrot.slane %v650_v18, 5 }
 0x1f3   : > { %988 = vmatpush.msrb.mxu3 %v1425_v20  ;;  %v665_v20 = vrot.slane %v649_v12, 6 }
 0x1f5   : > { %989 = vmatpush.msrb.mxu3 %v1439_v22  ;;  %v651_v22 = vld [vmem:[%s1348_s29 + $0x24] sm:$0x1] }
 0x1f7   : > { %990 = vmatpush.msrb.mxu3 %v1456_v27  ;;  %v664_v27 = vsel %vm277_vm0, %v663_v14, %v647_v16  ;;  %v838_v14 = vld [vmem:[%s1348_s29 + $0xe] sm:$0x1]  ;;  %v839_v16 = vld [vmem:[%s1348_s29 + $0x16] sm:$0x1] }
 0x1f8   : > { %v666_v36 = vsel %vm280_vm1, %v665_v20, %v664_v27  ;;  %v853_v18 = vrot.slane %v838_v14, 7  ;;  %v837_v20 = vld [vmem:[%s1348_s29 + $0x6] sm:$0x1]  ;;  %v855_v27 = vrot.slane %v839_v16, 6 }
 0x1f9   : > { %991 = vmatpush.msrb.mxu3 %v1472_v34  ;;  %v652_v34 = vld [vmem:[%s1348_s29 + $0x2c] sm:$0x1] }
 0x1fa   : > { %v671_v46 = vrot.slane %v652_v34, 3  ;;  %v854_v34 = vsel %vm277_vm0, %v853_v18, %v837_v20 }
 0x1fb   : > { %992 = vmatpush.msrb.mxu3 %v1487_v37  ;;  %v669_v37 = vrot.slane %v651_v22, 4  ;;  %v840_v22 = vld [vmem:[%s1348_s29 + $0x1e] sm:$0x1] }
 0x1fd   : > { %993 = vmatpush.msrb.mxu3 %v1504_v43  ;;  %v668_v43 = vsel %vm283_vm2, %v667_v33, %v666_v36  ;;  %v841_v33 = vld [vmem:[%s1348_s29 + $0x26] sm:$0x1]  ;;  %v857_v36 = vrot.slane %v840_v22, 5 }
 0x1fe   : > { %v670_v49 = vsel %vm286_vm3, %v669_v37, %v668_v43  ;;  %v842_v37 = vld [vmem:[%s1348_s29 + $0x2e] sm:$0x1]  ;;  %v859_v43 = vrot.slane %v841_v33, 4 }
 0x1ff   : > { %994 = vmatpush.msrb.mxu3 %v1519_v47  ;;  %v654_v47 = vld [vmem:[%s1348_s29 + $0x3c] sm:$0x1]  ;;  %v672_v54 = vsel %vm289_vm4, %v671_v46, %v670_v49  ;;  %v843_v46 = vld [vmem:[%s1348_s29 + $0x36] sm:$0x1]  ;;  %v861_v49 = vrot.slane %v842_v37, 3 }
 0x201   : > { %995 = vmatpush.msrb.mxu3 %v1534_v50  ;;  %v673_v50 = vrot.slane %v653_v42, 2  ;;  %v856_v42 = vsel %vm280_vm1, %v855_v27, %v854_v34 }
 0x203   : > { %996 = vmatpush.msrb.mxu3 %v1550_v55  ;;  %v675_v55 = vrot.slane %v654_v47, 1  ;;  %v674_v57 = vsel %vm292_vm5, %v673_v50, %v672_v54  ;;  %v858_v47 = vsel %vm283_vm2, %v857_v36, %v856_v42  ;;  %v844_v50 = vld [vmem:[%s1348_s29 + $0x3e] sm:$0x1]  ;;  %s1181_s29 = sshll.u32 (%p1332_p6), %s1271_s11, 3 }
 0x204   : > { %v860_v54 = vsel %vm286_vm3, %v859_v43, %v858_v47  ;;  %s1039_s17 = scalar_lea.vmem (%p1332_p6), %s1984_s2, %s1181_s29 }
 0x205   : > { %997 = vmatpush.msrb.mxu3 %v1564_v58  ;;  %v676_v58 = vsel %vm295_vm6, %v675_v55, %v674_v57  ;;  %v863_v55 = vrot.slane %v843_v46, 2  ;;  %v862_v57 = vsel %vm289_vm4, %v861_v49, %v860_v54 }
 0x206   : > { %694 = vmatmul.f32.vlgmr.msra.gmra.mxu0 %v676_v58  ;;  %v865_v58 = vrot.slane %v844_v50, 1 }
 0x207   : > { %998 = vmatpush.msrb.mxu3 %v1579_v61 }
 0x26b   : > { %v620_v61 = vpop.f32.mrf.mxu3 }
 0x26c   : > { %v621_v53 = vadd.f32 %v620_v61, %v600_v60  ;;  %v864_v60 = vsel %vm292_vm5, %v863_v55, %v862_v57 }
 0x26d   : > { %v866_v61 = vsel %vm295_vm6, %v865_v58, %v864_v60 }
 0x26e   : > { %1231 = vtanh.f32 %v621_v53  ;;  %884 = vmatmul.f32.vlgmr.msrb.gmra.mxu0 %v866_v61  ;;  %v790_v53 = vpop.f32.mrf.mxu2 }
 0x274   : > { %v1232_v56 = vpop.eup %1231 }
 0x275   : > { %v625_v59 = vrot.slane %v1232_v56, 1  ;;  %v626_v62 = vrot.slane %v1232_v56, 2  ;;  %v627_v63 = vrot.slane %v1232_v56, 3  ;;  %639 = vst [vmem:[%s1350_s30 + $0x3] sm:$0x1] %v1232_v56  ;;  %714 = vmatmul.f32.vlgmr.msra.gmra.mxu1 %v1232_v56  ;;  %v628_v0 = vrot.slane %v1232_v56, 4 }
 0x276   : > { %v629_v1 = vrot.slane %v1232_v56, 5  ;;  %v630_v2 = vrot.slane %v1232_v56, 6  ;;  %v631_v3 = vrot.slane %v1232_v56, 7 }
 0x277   : > { %640 = vst [vmem:[%s1350_s30 + $0xb] sm:$0x1] %v625_v59 }
 0x278   : > { %641 = vst [vmem:[%s1350_s30 + $0x13] sm:$0x1] %v626_v62 }
 0x279   : > { %642 = vst [vmem:[%s1350_s30 + $0x1b] sm:$0x1] %v627_v63 }
 0x27a   : > { %643 = vst [vmem:[%s1350_s30 + $0x23] sm:$0x1] %v628_v0 }
 0x27b   : > { %644 = vst [vmem:[%s1350_s30 + $0x2b] sm:$0x1] %v629_v1 }
 0x27c   : > { %645 = vst [vmem:[%s1350_s30 + $0x33] sm:$0x1] %v630_v2 }
 0x27d   : > { %646 = vst [vmem:[%s1350_s30 + $0x3b] sm:$0x1] %v631_v3 }
 0x283   : > { %v695_v52 = vpop.f32.mrf.mxu0 }
 0x2f2   : > { %v715_v9 = vpop.f32.mrf.mxu1 }
 0x2f3   : > { %v716_v11 = vadd.f32 %v715_v9, %v695_v52  ;;  %v959_v52 = vsel %vm292_vm5, %v958_v45, %v957_v48 }
 0x2f4   : > { %v961_v9 = vsel %vm295_vm6, %v960_v51, %v959_v52 }
 0x2f5   : > { %1233 = vtanh.f32 %v716_v11  ;;  %979 = vmatmul.f32.vlgmr.msrb.gmra.mxu2 %v961_v9  ;;  %v885_v11 = vpop.f32.mrf.mxu0 }
 0x2fb   : > { %v1234_v13 = vpop.eup %1233 }
 0x2fc   : > { %v720_v15 = vrot.slane %v1234_v13, 1  ;;  %v721_v17 = vrot.slane %v1234_v13, 2  ;;  %v722_v19 = vrot.slane %v1234_v13, 3  ;;  %734 = vst [vmem:[%s1350_s30 + $0x4] sm:$0x1] %v1234_v13  ;;  %809 = vmatmul.f32.vlgmr.msra.gmra.mxu3 %v1234_v13  ;;  %v723_v21 = vrot.slane %v1234_v13, 4 }
 0x2fd   : > { %v724_v26 = vrot.slane %v1234_v13, 5  ;;  %v725_v10 = vrot.slane %v1234_v13, 6  ;;  %v726_v12 = vrot.slane %v1234_v13, 7 }
 0x2fe   : > { %735 = vst [vmem:[%s1350_s30 + $0xc] sm:$0x1] %v720_v15 }
 0x2ff   : > { %736 = vst [vmem:[%s1350_s30 + $0x14] sm:$0x1] %v721_v17 }
 0x300   : > { %737 = vst [vmem:[%s1350_s30 + $0x1c] sm:$0x1] %v722_v19 }
 0x301   : > { %738 = vst [vmem:[%s1350_s30 + $0x24] sm:$0x1] %v723_v21 }
 0x302   : > { %739 = vst [vmem:[%s1350_s30 + $0x2c] sm:$0x1] %v724_v26 }
 0x303   : > { %740 = vst [vmem:[%s1350_s30 + $0x34] sm:$0x1] %v725_v10 }
 0x304   : > { %741 = vst [vmem:[%s1350_s30 + $0x3c] sm:$0x1] %v726_v12 }
 0x378   : > { %v980_v18 = vpop.f32.mrf.mxu2 }
 0x37f   : > { %v810_v56 = vpop.f32.mrf.mxu3 }
 0x380   : > { %v811_v59 = vadd.f32 %v810_v56, %v790_v53 }
 0x382   : > { %1235 = vtanh.f32 %v811_v59 }
 0x388   : > { %v1236_v62 = vpop.eup %1235 }
 0x389   : > { %v815_v63 = vrot.slane %v1236_v62, 1  ;;  %v816_v0 = vrot.slane %v1236_v62, 2  ;;  %v817_v1 = vrot.slane %v1236_v62, 3  ;;  %829 = vst [vmem:[%s1350_s30 + $0x5] sm:$0x1] %v1236_v62  ;;  %904 = vmatmul.f32.vlgmr.msrb.gmra.mxu1 %v1236_v62  ;;  %v818_v2 = vrot.slane %v1236_v62, 4 }
 0x38a   : > { %v819_v3 = vrot.slane %v1236_v62, 5  ;;  %v820_v4 = vrot.slane %v1236_v62, 6  ;;  %v821_v5 = vrot.slane %v1236_v62, 7 }
 0x38b   : > { %830 = vst [vmem:[%s1350_s30 + $0xd] sm:$0x1] %v815_v63 }
 0x38c   : > { %831 = vst [vmem:[%s1350_s30 + $0x15] sm:$0x1] %v816_v0 }
 0x38d   : > { %832 = vst [vmem:[%s1350_s30 + $0x1d] sm:$0x1] %v817_v1 }
 0x38e   : > { %833 = vst [vmem:[%s1350_s30 + $0x25] sm:$0x1] %v818_v2 }
 0x38f   : > { %834 = vst [vmem:[%s1350_s30 + $0x2d] sm:$0x1] %v819_v3 }
 0x390   : > { %835 = vst [vmem:[%s1350_s30 + $0x35] sm:$0x1] %v820_v4 }
 0x391   : > { %836 = vst [vmem:[%s1350_s30 + $0x3d] sm:$0x1] %v821_v5 }
 0x406   : > { %v905_v13 = vpop.f32.mrf.mxu1 }
 0x407   : > { %v906_v15 = vadd.f32 %v905_v13, %v885_v11 }
 0x409   : > { %1237 = vtanh.f32 %v906_v15 }
 0x40f   : > { %v1238_v17 = vpop.eup %1237 }
 0x410   : > { %v910_v19 = vrot.slane %v1238_v17, 1  ;;  %v911_v21 = vrot.slane %v1238_v17, 2  ;;  %v912_v26 = vrot.slane %v1238_v17, 3  ;;  %924 = vst [vmem:[%s1350_s30 + $0x6] sm:$0x1] %v1238_v17  ;;  %999 = vmatmul.f32.vlgmr.msrb.gmra.mxu3 %v1238_v17  ;;  %v913_v10 = vrot.slane %v1238_v17, 4 }
 0x411   : > { %v914_v12 = vrot.slane %v1238_v17, 5  ;;  %v915_v14 = vrot.slane %v1238_v17, 6  ;;  %v916_v16 = vrot.slane %v1238_v17, 7 }
 0x412   : > { %925 = vst [vmem:[%s1350_s30 + $0xe] sm:$0x1] %v910_v19 }
 0x413   : > { %926 = vst [vmem:[%s1350_s30 + $0x16] sm:$0x1] %v911_v21 }
 0x414   : > { %927 = vst [vmem:[%s1350_s30 + $0x1e] sm:$0x1] %v912_v26 }
 0x415   : > { %928 = vst [vmem:[%s1350_s30 + $0x26] sm:$0x1] %v913_v10 }
 0x416   : > { %929 = vst [vmem:[%s1350_s30 + $0x2e] sm:$0x1] %v914_v12 }
 0x417   : > { %930 = vst [vmem:[%s1350_s30 + $0x36] sm:$0x1] %v915_v14 }
 0x418   : > { %931 = vst [vmem:[%s1350_s30 + $0x3e] sm:$0x1] %v916_v16 }
 0x493   : > { %v1000_v20 = vpop.f32.mrf.mxu3 }
 0x494   : > { %v1001_v22 = vadd.f32 %v1000_v20, %v980_v18 }
 0x496   : > { %1239 = vtanh.f32 %v1001_v22 }
 0x49c   : > { %v1240_v27 = vpop.eup %1239 }
 0x49d   : > { %v1005_v33 = vrot.slane %v1240_v27, 1  ;;  %v1006_v34 = vrot.slane %v1240_v27, 2  ;;  %v1007_v36 = vrot.slane %v1240_v27, 3  ;;  %1019 = vst [vmem:[%s1350_s30 + $0x7] sm:$0x1] %v1240_v27  ;;  %v1008_v37 = vrot.slane %v1240_v27, 4 }
 0x49e   : > { %1027 = vst [vmem:[#allocation2] sm:$0xff] %v1240_v27  ;;  %v1009_v42 = vrot.slane %v1240_v27, 5  ;;  %v1010_v43 = vrot.slane %v1240_v27, 6  ;;  %v1011_v46 = vrot.slane %v1240_v27, 7 }
 0x49f   : > { %1020 = vst [vmem:[%s1350_s30 + $0xf] sm:$0x1] %v1005_v33 }
 0x4a0   : > { %1021 = vst [vmem:[%s1350_s30 + $0x17] sm:$0x1] %v1006_v34 }
 0x4a1   : > { %1022 = vst [vmem:[%s1350_s30 + $0x1f] sm:$0x1] %v1007_v36  ;;  %1034 = sbr.rel (!%p1332_p6) target bundleno = 1198 (0x4ae), region = 74 }
 0x4a2   : > { %1023 = vst [vmem:[%s1350_s30 + $0x27] sm:$0x1] %v1008_v37 }
 0x4a3   : > { %1024 = vst [vmem:[%s1350_s30 + $0x2f] sm:$0x1] %v1009_v42 }
 0x4a4   : > { %1025 = vst [vmem:[%s1350_s30 + $0x37] sm:$0x1] %v1010_v43  ;;  %v1082_v47 = vld [vmem:[%s1350_s30] sm:$0xff] (%p1332_p6) }
 0x4a5   : > { %1026 = vst [vmem:[%s1350_s30 + $0x3f] sm:$0x1] %v1011_v46 }
 0x4a6   : > { %v1084_v49 = vld [vmem:[%s1350_s30 + $0x8] sm:$0xff]  ;;  %1083 = vst [vmem:[%s1039_s17] sm:$0xff] %v1082_v47 }
 0x4a7   : > { %v1086_v50 = vld [vmem:[%s1350_s30 + $0x10] sm:$0xff]  ;;  %1085 = vst [vmem:[%s1039_s17 + $0x10] sm:$0xff] %v1084_v49 }
 0x4a8   : > { %v1088_v54 = vld [vmem:[%s1350_s30 + $0x18] sm:$0xff]  ;;  %1087 = vst [vmem:[%s1039_s17 + $0x20] sm:$0xff] %v1086_v50 }
 0x4a9   : > { %v1090_v55 = vld [vmem:[%s1350_s30 + $0x20] sm:$0xff]  ;;  %1089 = vst [vmem:[%s1039_s17 + $0x30] sm:$0xff] %v1088_v54 }
 0x4aa   : > { %v1092_v57 = vld [vmem:[%s1350_s30 + $0x28] sm:$0xff]  ;;  %1091 = vst [vmem:[%s1039_s17 + $0x40] sm:$0xff] %v1090_v55 }
 0x4ab   : > { %v1094_v58 = vld [vmem:[%s1350_s30 + $0x30] sm:$0xff]  ;;  %1093 = vst [vmem:[%s1039_s17 + $0x50] sm:$0xff] %v1092_v57 }
 0x4ac   : > { %v1096_v60 = vld [vmem:[%s1350_s30 + $0x38] sm:$0xff]  ;;  %1095 = vst [vmem:[%s1039_s17 + $0x60] sm:$0xff] %v1094_v58 }
 0x4ad   : > { %1097 = vst [vmem:[%s1039_s17 + $0x70] sm:$0xff] %v1096_v60 }
 0x4ae PF: > { %s12_s13 = sadd.s32 1, %s1279_s13   ;;  %s1986_s9 = smov %s1267_s10 }
 0x4af   : > { %p9_p12 = scmp.ge.s32.totalorder %s12_s13, 4   ;;  %s1987_s10 = smov %s1337_s19 }
 0x4b0   : > { %s1988_s11 = smov %s1275_s12  ;;  %s1989_s12 = smov %s1991_s14 }
 0x4b1   :  { %11 = sbr.rel (!%p9_p12) target bundleno = 3 (0x3), region = 143 }

</bundles_post_ra>
